<compile_context>
chip_gen: v7x
topology: tpu7x:2x2x1
jax: 0.10.0
libtpu: 0.0.40
codegen_flags: <defaults>
</compile_context>

<pallas_src>
import jax
import jax.numpy as jnp
from jax.experimental import pallas as pl
from jax.experimental.pallas import tpu as pltpu

NUM_BITS = 8
FN = 4
_SCALE = float(2 ** FN)                       # 16.0
_INV_SCALE = 1.0 / _SCALE                     # 0.0625 (exact)
_MAX_INT_F = float(2 ** (NUM_BITS - 1) - 1)   # 127.0

_SUBLANE = 8
_TARGET_BLOCK_BYTES = 2 * 1024 * 1024         # 2 MiB f32 blocks


def _sbrelu_kernel(x_ref, o_ref):
    # floor(clip(x*16, 0, 127)) / 16 — pure VPU elementwise, stays in f32.
    a = jnp.clip(x_ref[...] * _SCALE, 0.0, _MAX_INT_F)
    o_ref[...] = jnp.floor(a) * _INV_SCALE


def _round_up(v, m):
    return ((v + m - 1) // m) * m


def sbrelu(x):
    """SBReLU forward (num_bits=8, fn=4, is_relu=True) for any-shape input."""
    orig_shape = x.shape
    flat = x.reshape(-1).astype(jnp.float32)
    n = flat.shape[0]

    # Widest lane-dense last dim that divides n -> avoids a wrapper pad+slice
    # (two extra full-array HBM passes) in the common case.
    lane = None
    for cand in (1024, 512, 256, 128):
        if n % cand == 0:
            lane = cand
            break
    if lane is None:
        lane = 128
        flat = jnp.pad(flat, (0, (-n) % lane))   # rare fallback for ragged sizes

    rows = flat.shape[0] // lane
    x2 = flat.reshape(rows, lane)

    # ~2 MiB blocks, but capped so the grid has >=2 steps when the input is
    # big enough (v7x has 2 TensorCores that a "parallel" axis shards across).
    block_rows = max(_SUBLANE, _TARGET_BLOCK_BYTES // (lane * 4))
    block_rows = min(block_rows, _round_up(pl.cdiv(rows, 2), _SUBLANE))
    block_rows = max(_SUBLANE, block_rows)
    grid = (pl.cdiv(rows, block_rows),)

    out2 = pl.pallas_call(
        _sbrelu_kernel,
        out_shape=jax.ShapeDtypeStruct((rows, lane), jnp.float32),
        grid=grid,
        in_specs=[pl.BlockSpec((block_rows, lane), lambda i: (i, 0))],
        out_specs=pl.BlockSpec((block_rows, lane), lambda i: (i, 0)),
        compiler_params=pltpu.CompilerParams(dimension_semantics=("parallel",)),
    )(x2)

    out_flat = out2.reshape(-1)
    if out_flat.shape[0] != n:
        out_flat = out_flat[:n]
    return out_flat.reshape(orig_shape)


def _sbrelu_ref(x):
    """Pure-JAX reference mirroring the PyTorch forward bit-for-bit."""
    scale = 2 ** FN
    max_value_int = 2 ** (NUM_BITS - 1) - 1
    a = (x * scale).astype(jnp.int32)                    # trunc toward zero
    a = jnp.clip(a, 0, max_value_int) & (2 ** NUM_BITS - 1)
    xb = a & (2 ** NUM_BITS - 1)
    y = jnp.where((xb >> (NUM_BITS - 1)) != 0,
                  -(2 ** NUM_BITS - xb),
                  xb & (2 ** (NUM_BITS - 1) - 1))
    return y.astype(jnp.float32) / scale


# TODO(synk): backward pass (grad_output masked by input<0) is autograd-only in
# the PyTorch module; only the forward is implemented here.

if __name__ == "__main__":
    key = jax.random.PRNGKey(0)
    k1, k2 = jax.random.split(key)

    # NCHW input; scaled so both the ReLU floor (negatives -> 0) and the
    # +127/16 saturation branch are exercised.
    x = jax.random.normal(k1, (2, 4, 16, 16), dtype=jnp.float32) * 6.0
    out = jax.block_until_ready(sbrelu(x))
    ref = _sbrelu_ref(x)
    assert out.shape == x.shape and out.dtype == jnp.float32
    assert jnp.max(jnp.abs(out - ref)) == 0.0, "mismatch vs reference"

    # Ragged element count (exercises the pad fallback path).
    x2 = jax.random.normal(k2, (3, 5, 7, 11), dtype=jnp.float32) * 6.0
    out2 = jax.block_until_ready(sbrelu(x2))
    ref2 = _sbrelu_ref(x2)
    assert out2.shape == x2.shape
    assert jnp.max(jnp.abs(out2 - ref2)) == 0.0, "mismatch vs reference (ragged)"

    print("KERNEL_OK")
</pallas_src>

<mosaic_0001>
module attributes {stable_mosaic.version = 11 : i64} {
  func.func @_sbrelu_kernel(%arg0: i32, %arg1: memref<8x1024xf32, #tpu.memory_space<vmem>>, %arg2: memref<8x1024xf32, #tpu.memory_space<vmem>>) attributes {dimension_semantics = [#tpu.dimension_semantics<parallel>], iteration_bounds = array<i64: 1>, scalar_prefetch = 0 : i64, scratch_operands = 0 : i64, tpu.core_type = #tpu.core_type<tc>, window_params = [{transform_indices = @transform_0, window_bounds = array<i64: 8, 1024>}, {transform_indices = @transform_1, window_bounds = array<i64: 8, 1024>}]} {
    %c0 = arith.constant 0 : index
    %c0_0 = arith.constant 0 : index
    %0 = vector.load %arg1[%c0, %c0_0] : memref<8x1024xf32, #tpu.memory_space<vmem>>, vector<8x1024xf32>
    %cst = arith.constant 1.600000e+01 : f32
    %1 = vector.broadcast %cst : f32 to vector<8x1024xf32>
    %2 = arith.mulf %0, %1 : vector<8x1024xf32>
    %cst_1 = arith.constant 0.000000e+00 : f32
    %cst_2 = arith.constant 1.270000e+02 : f32
    %3 = vector.broadcast %cst_1 : f32 to vector<8x1024xf32>
    %4 = arith.maximumf %3, %2 : vector<8x1024xf32>
    %5 = vector.broadcast %cst_2 : f32 to vector<8x1024xf32>
    %6 = arith.minimumf %5, %4 : vector<8x1024xf32>
    %7 = math.floor %6 : vector<8x1024xf32>
    %cst_3 = arith.constant 6.250000e-02 : f32
    %8 = vector.broadcast %cst_3 : f32 to vector<8x1024xf32>
    %9 = arith.mulf %7, %8 : vector<8x1024xf32>
    %c0_4 = arith.constant 0 : index
    %c0_5 = arith.constant 0 : index
    %10 = vector.load %arg2[%c0_4, %c0_5] : memref<8x1024xf32, #tpu.memory_space<vmem>>, vector<8x1024xf32>
    tpu.vector_store %arg2[%c0_4, %c0_5], %9 {strides = array<i32>} : memref<8x1024xf32, #tpu.memory_space<vmem>>, vector<8x1024xf32>,
    return
  }
  func.func @transform_0(%arg0: i32) -> (i32, i32) {
    %c0_i32 = arith.constant 0 : i32
    %c0_i32_0 = arith.constant 0 : i32
    return %arg0, %c0_i32 : i32, i32
  }
  func.func @transform_1(%arg0: i32) -> (i32, i32) {
    %c0_i32 = arith.constant 0 : i32
    %c0_i32_0 = arith.constant 0 : i32
    return %arg0, %c0_i32 : i32, i32
  }
}

</mosaic_0001>

<bundles_post_ra>
// kernel: tpu_custom_call.1
= control target key start
LH: loop header
LB: loop body
LE: loop exit
PB: predicated region body
PF: predicated region fallthrough
CT: control target
= control target key end

     0   :  { %6 = vsyncpa [#allocation3], 0  ;;  %s192_s0 = inlined_call_operand.hbm [shape: f32[2,1024], index: 0, kind: input, shape index: {}]   ;;  %s193_s1 = inlined_call_operand.hbm [shape: f32[2,1024], index: 1, kind: output, shape index: {}]  }
   0x1   :  { %7 = vsyncpa [#allocation4], 0 }
   0x2   :  { %12 = vsyncadd [#allocation3], 768  ;;  %s148_s6 = smov [#allocation2]   ;;  %s100_s10 = scalar_lea.hbm %s192_s0, 256 }
   0x3   :  { %s13_s7 = sshll.u32 %s148_s6, 4  ;;  %p101_p0 = scmp.ne.s32.totalorder %s192_s0, %s100_s10  ;;  %s14_s7 = int_to_ptr.vmem [resolvable:$true] %s13_s7 }
   0x4   :  { %p104_p1 = scmp.lt.u32.totalorder %s100_s10, %s192_s0 }
   0x6   :  { %p106_p2 = pnand %p104_p1, %p101_p0 }
   0x8   :  { %109 = shalt.err (!%p106_p2)
}
   0x9   :  { %s110_s15 = scalar_lea.vmem %s14_s7, 256  ;;  %s114_s16 = scalar_lea.vmem %s14_s7, 1024 }
   0xa   :  { %p111_p3 = scmp.ne.s32.totalorder %s14_s7, %s110_s15  ;;  %p115_p4 = scmp.lt.s32.totalorder %s14_s7, %s14_s7 }
   0xb   :  { %p116_p5 = scmp.lt.s32.totalorder %s114_s16, %s110_s15 }
   0xd   :  { %p117_p6 = por %p116_p5, %p115_p4 }
   0xf   :  { %p118_p7 = pnand %p117_p6, %p111_p3 }
  0x11   :  { %121 = shalt.err (!%p118_p7)
}
  0x12   :  { %s149_s17 = smov 256   ;;  %s150_s18 = smov 16  }
  0x13   :  { %19 = dma.hbm_to_vmem [thread:$0]  %s192_s0, 256, %s14_s7, [#allocation3], %s149_s17, %s149_s17, %s150_s18  }
  0x14   :  { %144 = dma.done.wait [#allocation3], 1024  }
  0x15   :  { %145 = vsyncadd [#allocation3], 4294966272  ;;  %v23_v0 = vld [vmem:[#allocation2] sm:$0xff]  ;;  %v24_v1 = vld [vmem:[#allocation2 + $0x8] sm:$0xff] }
  0x16   :  { %v25_v2 = vld [vmem:[#allocation2 + $0x10] sm:$0xff]  ;;  %v31_v3 = vmul.f32 16.0, %v23_v0  ;;  %v32_v4 = vmul.f32 16.0, %v24_v1  ;;  %v26_v6 = vld [vmem:[#allocation2 + $0x18] sm:$0xff]  ;;  %v27_v7 = vld [vmem:[#allocation2 + $0x20] sm:$0xff] }
  0x17   :  { %v33_v5 = vmul.f32 16.0, %v25_v2  ;;  %v28_v8 = vld [vmem:[#allocation2 + $0x28] sm:$0xff]  ;;  %v34_v9 = vmul.f32 16.0, %v26_v6  ;;  %v35_v10 = vmul.f32 16.0, %v27_v7  ;;  %v29_v12 = vld [vmem:[#allocation2 + $0x30] sm:$0xff]  ;;  %v30_v13 = vld [vmem:[#allocation2 + $0x38] sm:$0xff] }
  0x18   :  { %v36_v11 = vmul.f32 16.0, %v28_v8  ;;  %v39_v14 = vmax.f32 %v31_v3, 0.0  ;;  %v40_v15 = vmax.f32 %v32_v4, 0.0  ;;  %v37_v17 = vmul.f32 16.0, %v29_v12 }
  0x19   :  { %v41_v16 = vmax.f32 %v33_v5, 0.0  ;;  %v42_v18 = vmax.f32 %v34_v9, 0.0  ;;  %v43_v19 = vmax.f32 %v35_v10, 0.0  ;;  %v38_v21 = vmul.f32 16.0, %v30_v13 }
  0x1a   :  { %v44_v20 = vmax.f32 %v36_v11, 0.0  ;;  %v47_v22 = vmin.f32 %v39_v14, 127.0  ;;  %v48_v23 = vmin.f32 %v40_v15, 127.0  ;;  %v45_v25 = vmax.f32 %v37_v17, 0.0 }
  0x1b   :  { %v49_v24 = vmin.f32 %v41_v16, 127.0  ;;  %v50_v26 = vmin.f32 %v42_v18, 127.0  ;;  %v51_v27 = vmin.f32 %v43_v19, 127.0  ;;  %v46_v29 = vmax.f32 %v38_v21, 0.0 }
  0x1c   :  { %v52_v28 = vmin.f32 %v44_v20, 127.0  ;;  %v55_v30 = vfloor.f32 %v47_v22  ;;  %v56_v31 = vfloor.f32 %v48_v23  ;;  %v53_v33 = vmin.f32 %v45_v25, 127.0 }
  0x1d   :  { %v57_v32 = vfloor.f32 %v49_v24  ;;  %v58_v34 = vfloor.f32 %v50_v26  ;;  %v59_v35 = vfloor.f32 %v51_v27  ;;  %v54_v37 = vmin.f32 %v46_v29, 127.0 }
  0x1e   :  { %v60_v36 = vfloor.f32 %v52_v28  ;;  %v63_v38 = vmul.f32 0.0625, %v55_v30  ;;  %v64_v39 = vmul.f32 0.0625, %v56_v31  ;;  %v61_v41 = vfloor.f32 %v53_v33 }
  0x1f   :  { %v65_v40 = vmul.f32 0.0625, %v57_v32  ;;  %v66_v42 = vmul.f32 0.0625, %v58_v34  ;;  %v67_v43 = vmul.f32 0.0625, %v59_v35  ;;  %v62_v45 = vfloor.f32 %v54_v37 }
  0x20   :  { %v68_v44 = vmul.f32 0.0625, %v60_v36  ;;  %71 = vst [vmem:[#allocation5] sm:$0xff] %v63_v38  ;;  %72 = vst [vmem:[#allocation5 + $0x8] sm:$0xff] %v64_v39  ;;  %v69_v46 = vmul.f32 0.0625, %v61_v41 }
  0x21   :  { %73 = vst [vmem:[#allocation5 + $0x10] sm:$0xff] %v65_v40  ;;  %74 = vst [vmem:[#allocation5 + $0x18] sm:$0xff] %v66_v42  ;;  %v70_v47 = vmul.f32 0.0625, %v62_v45 }
  0x22   :  { %75 = vst [vmem:[#allocation5 + $0x20] sm:$0xff] %v67_v43  ;;  %76 = vst [vmem:[#allocation5 + $0x28] sm:$0xff] %v68_v44 }
  0x23   :  { %77 = vst [vmem:[#allocation5 + $0x30] sm:$0xff] %v69_v46  ;;  %78 = vst [vmem:[#allocation5 + $0x38] sm:$0xff] %v70_v47 }
  0x24   :  { %83 = vsyncadd [#allocation4], 768  ;;  %s151_s0 = smov [#allocation5]  }
  0x25   :  { %s84_s21 = sshll.u32 %s151_s0, 4  ;;  %s85_s21 = int_to_ptr.vmem [resolvable:$true] %s84_s21 }
  0x26   :  { %s122_s22 = scalar_lea.vmem %s85_s21, 256  ;;  %s126_s23 = scalar_lea.vmem %s85_s21, 1024 }
  0x27   :  { %p123_p8 = scmp.ne.s32.totalorder %s85_s21, %s122_s22  ;;  %p127_p9 = scmp.lt.s32.totalorder %s85_s21, %s85_s21 }
  0x28   :  { %p128_p10 = scmp.lt.s32.totalorder %s126_s23, %s122_s22 }
  0x2a   :  { %p129_p11 = por %p128_p10, %p127_p9 }
  0x2c   :  { %p130_p12 = pnand %p129_p11, %p123_p8 }
  0x2e   :  { %133 = shalt.err (!%p130_p12)
}
  0x2f   :  { %s134_s26 = scalar_lea.hbm %s193_s1, 256 }
  0x30   :  { %p135_p13 = scmp.ne.s32.totalorder %s193_s1, %s134_s26  ;;  %p138_p0 = scmp.lt.u32.totalorder %s134_s26, %s193_s1 }
  0x32   :  { %p140_p1 = pnand %p138_p0, %p135_p13 }
  0x34   :  { %143 = shalt.err (!%p140_p1)
}
  0x35   :  { %90 = dma.vmem_to_hbm [thread:$0]  %s85_s21, 256, %s193_s1, [#allocation4], %s149_s17, %s149_s17, %s150_s18  }
  0x36   :  { %146 = dma.done.wait [#allocation4], 1024  }
  0x37   :  { %147 = vsyncadd [#allocation4], 4294966272 }
  0x38   :  { %94 = vsyncpa [#allocation3], 1 }
  0x39   :  { %95 = vsyncpa [#allocation4], 1 }

</bundles_post_ra>
